<compile_context>
chip_gen: v5e
topology: v5e:2x2
jax: 0.10.0
libtpu: 0.0.40
codegen_flags: <defaults>
</compile_context>

<pallas_src>
import jax
import jax.numpy as jnp
from jax import lax
from jax.experimental import pallas as pl
from jax.experimental.pallas import tpu as pltpu


# Conservative tile-selection budget that fits every generation's default scoped
# VMEM (v5e: 16 MiB, v6e/v7x: 32 MiB); the actual limit is pinned per-call below.
_VMEM_BUDGET = 12 * 1024 * 1024


def prepare_lmapping_params(weight, bias):
    """One-time parameter prep (do at init, NOT per forward call).

    weight: (D_out, D_in) PyTorch nn.Linear layout  ->  (D_in, D_out)
    bias  : (D_out,)                                ->  (1, D_out)
    """
    w_t = jnp.asarray(weight).T               # paid exactly once
    b2 = jnp.asarray(bias).reshape(1, -1)
    return w_t, b2


def _choose_tiles(B, D_in, D_out, itemsize=4, vmem_budget=_VMEM_BUDGET):
    """Pick (tm, tn): batch tile and D_out tile."""
    # N-tiling of the weight only when the double-buffered resident weight gets
    # big (large latent_dim; keeps the kernel usable inside v7x's smaller VMEM).
    tn = D_out
    if 2 * D_in * D_out * itemsize > vmem_budget // 4 and D_out % 256 == 0:
        tn = 256
        while (tn * 2 <= D_out and D_out % (tn * 2) == 0
               and 2 * D_in * (tn * 2) * itemsize <= vmem_budget // 4):
            tn *= 2

    if B <= 8:
        tm = B                                        # block == full dim -> legal
    else:
        resident = 2 * (D_in * tn + tn) * itemsize    # W + b (double-buffered)
        per_row = 2 * (D_in + tn) * itemsize          # x + out rows (double-buffered)
        tm_cap = max(8, (vmem_budget - resident) // per_row)
        tm = min(B, 4096, tm_cap)
        if B >= 16:
            tm = min(tm, B // 2)                      # >=2 grid steps for v7x's 2 TCs
        tm = max(8, (tm // 8) * 8)                    # f32 sublane multiple
    return tm, tn


def _linear_kernel(x_ref, w_ref, b_ref, o_ref):
    # x_ref: (tm, D_in)   batch tile
    # w_ref: (D_in, tn)   pre-transposed weight tile (resident when tn == D_out)
    # b_ref: (1, tn)      bias tile
    # o_ref: (tm, tn)     output tile
    acc = lax.dot_general(
        x_ref[...], w_ref[...],
        dimension_numbers=(((1,), (0,)), ((), ())),   # plain (M,K)@(K,N) -> no vxpose
        preferred_element_type=jnp.float32,
    )
    # Epilogue kept in f32 (safe on v5e: no bf16 VPU).
    o_ref[...] = (acc + b_ref[...]).astype(o_ref.dtype)


def lmapping_forward(x, w_t, b2):
    """y = x @ w_t + b2 with w_t = weight.T prepared once by prepare_lmapping_params."""
    B, D_in = x.shape
    D_in_w, D_out = w_t.shape
    assert D_in_w == D_in, "prepared weight must be (D_in, D_out)"
    assert b2.shape == (1, D_out)

    itemsize = jnp.dtype(x.dtype).itemsize
    tm, tn = _choose_tiles(B, D_in, D_out, itemsize)
    grid = (pl.cdiv(B, tm), pl.cdiv(D_out, tn))

    # Real working set (all BlockSpec operands double-buffered) + headroom.
    working = (2 * tm * D_in + 2 * tm * tn + 2 * D_in * tn + 2 * tn) * itemsize
    vmem_limit = max(int(1.5 * working), 2 * 1024 * 1024)

    # True (unpadded) cost so XLA doesn't over-serialize around this small call.
    cost = pl.CostEstimate(
        flops=2 * B * D_in * D_out,
        transcendentals=0,
        bytes_accessed=itemsize * (B * D_in + D_in * D_out + D_out + B * D_out),
    )

    return pl.pallas_call(
        _linear_kernel,
        out_shape=jax.ShapeDtypeStruct((B, D_out), x.dtype),
        grid=grid,
        in_specs=[
            pl.BlockSpec((tm, D_in), lambda i, j: (i, 0)),   # batch tile of x
            pl.BlockSpec((D_in, tn), lambda i, j: (0, j)),   # weight tile (resident if tn==D_out)
            pl.BlockSpec((1, tn), lambda i, j: (0, j)),      # bias tile
        ],
        out_specs=pl.BlockSpec((tm, tn), lambda i, j: (i, j)),
        compiler_params=pltpu.CompilerParams(
            dimension_semantics=("parallel", "parallel"),    # no reduction axes
            vmem_limit_bytes=vmem_limit,
        ),
        cost_estimate=cost,
    )(x, w_t, b2)


if __name__ == "__main__":
    key = jax.random.PRNGKey(0)
    latent_dim = 32
    batch = 8

    kx, kw, kb = jax.random.split(key, 3)

    # Deterministic synthetic parameters (shapes per nn.Linear(latent_dim, latent_dim)).
    bound = 1.0 / (latent_dim ** 0.5)
    weight = jax.random.uniform(kw, (latent_dim, latent_dim),
                                minval=-bound, maxval=bound, dtype=jnp.float32)
    bias = jax.random.uniform(kb, (latent_dim,),
                              minval=-bound, maxval=bound, dtype=jnp.float32)

    x = jax.random.normal(kx, (batch, latent_dim), dtype=jnp.float32)

    # One-time parameter prep (init-time), then forward.
    w_t, b2 = prepare_lmapping_params(weight, bias)
    y = lmapping_forward(x, w_t, b2)
    y = jax.block_until_ready(y)

    # Reference check against plain JAX (nn.Linear semantics).
    y_ref = x @ weight.T + bias
    assert y.shape == (batch, latent_dim)
    assert jnp.allclose(y, y_ref, atol=1e-5, rtol=1e-5)

    print("KERNEL_OK")
</pallas_src>

<mosaic_0001>
module attributes {stable_mosaic.version = 11 : i64} {
  func.func @_linear_kernel(%arg0: i32, %arg1: i32, %arg2: memref<8x32xf32, #tpu.memory_space<vmem>>, %arg3: memref<32x32xf32, #tpu.memory_space<vmem>>, %arg4: memref<1x32xf32, #tpu.memory_space<vmem>>, %arg5: memref<8x32xf32, #tpu.memory_space<vmem>>) attributes {dimension_semantics = [#tpu.dimension_semantics<parallel>, #tpu.dimension_semantics<parallel>], iteration_bounds = array<i64: 1, 1>, scalar_prefetch = 0 : i64, scratch_operands = 0 : i64, tpu.core_type = #tpu.core_type<tc>, window_params = [{transform_indices = @transform_0, window_bounds = array<i64: 8, 32>}, {transform_indices = @transform_1, window_bounds = array<i64: 32, 32>}, {transform_indices = @transform_2, window_bounds = array<i64: 1, 32>}, {transform_indices = @transform_3, window_bounds = array<i64: 8, 32>}]} {
    %c0 = arith.constant 0 : index
    %c0_0 = arith.constant 0 : index
    %0 = vector.load %arg2[%c0, %c0_0] : memref<8x32xf32, #tpu.memory_space<vmem>>, vector<8x32xf32>
    %c0_1 = arith.constant 0 : index
    %c0_2 = arith.constant 0 : index
    %1 = vector.load %arg3[%c0_1, %c0_2] : memref<32x32xf32, #tpu.memory_space<vmem>>, vector<32x32xf32>
    %cst = arith.constant dense<0.000000e+00> : vector<8x32xf32>
    %2 = tpu.matmul %0, %1, %cst {dimension_numbers = #tpu.dot_dimension_numbers<[1], [0], [0], [1], [0, 0, 1, 1], [], []>} : vector<8x32xf32>, vector<32x32xf32>, vector<8x32xf32> -> vector<8x32xf32>
    %c0_3 = arith.constant 0 : index
    %c0_4 = arith.constant 0 : index
    %3 = vector.load %arg4[%c0_3, %c0_4] : memref<1x32xf32, #tpu.memory_space<vmem>>, vector<1x32xf32>
    %4 = vector.broadcast %3 : vector<1x32xf32> to vector<8x32xf32>
    %5 = arith.addf %2, %4 : vector<8x32xf32>
    %c0_5 = arith.constant 0 : index
    %c0_6 = arith.constant 0 : index
    %6 = vector.load %arg5[%c0_5, %c0_6] : memref<8x32xf32, #tpu.memory_space<vmem>>, vector<8x32xf32>
    tpu.vector_store %arg5[%c0_5, %c0_6], %5 {strides = array<i32>} : memref<8x32xf32, #tpu.memory_space<vmem>>, vector<8x32xf32>,
    return
  }
  func.func @transform_0(%arg0: i32, %arg1: i32) -> (i32, i32) {
    %c0_i32 = arith.constant 0 : i32
    %c0_i32_0 = arith.constant 0 : i32
    return %arg0, %c0_i32 : i32, i32
  }
  func.func @transform_1(%arg0: i32, %arg1: i32) -> (i32, i32) {
    %c0_i32 = arith.constant 0 : i32
    %c0_i32_0 = arith.constant 0 : i32
    return %c0_i32, %arg1 : i32, i32
  }
  func.func @transform_2(%arg0: i32, %arg1: i32) -> (i32, i32) {
    %c0_i32 = arith.constant 0 : i32
    %c0_i32_0 = arith.constant 0 : i32
    return %c0_i32, %arg1 : i32, i32
  }
  func.func @transform_3(%arg0: i32, %arg1: i32) -> (i32, i32) {
    %c0_i32 = arith.constant 0 : i32
    return %arg0, %arg1 : i32, i32
  }
}

</mosaic_0001>

<bundles_post_ra>
// kernel: tpu_custom_call.1
= control target key start
LH: loop header
LB: loop body
LE: loop exit
PB: predicated region body
PF: predicated region fallthrough
CT: control target
= control target key end

     0   :  { %8 = vsyncpa [#allocation3], 0  ;;  %s219_s0 = inlined_call_operand.hbm [shape: f32[8,32], index: 0, kind: input, shape index: {}]   ;;  %s220_s1 = inlined_call_operand.hbm [shape: f32[32,32], index: 1, kind: input, shape index: {}]   ;;  %s221_s2 = inlined_call_operand.vmem [shape: f32[1,32], index: 2, kind: input, shape index: {}]   ;;  %s222_s3 = inlined_call_operand.hbm [shape: f32[8,32], index: 3, kind: output, shape index: {}]  }
   0x1   :  { %9 = vsyncpa [#allocation6], 0 }
   0x2   :  { %10 = vsyncpa [#allocation4], 0  ;;  %s16_s14 = sshll.u32 %s219_s0, 4  ;;  %s182_s15 = smov [#allocation2]   ;;  %s17_s14 = int_to_ptr.hbm [resolvable:$true] %s16_s14 }
   0x3   :  { %s18_s16 = sshll.u32 %s182_s15, 4  ;;  %s26_s19 = sshll.u32 %s220_s1, 4  ;;  %s19_s16 = int_to_ptr.vmem [resolvable:$true] %s18_s16  ;;  %s27_s19 = int_to_ptr.hbm [resolvable:$true] %s26_s19 }
   0x4   :  { %21 = dma.hbm_to_vmem [thread:$0]  %s17_s14, 128, %s19_s16, [#allocation3]  }
   0x5   :  { %s183_s20 = smov [#allocation5]   ;;  %s184_s22 = smov 128  }
   0x6   :  { %s28_s21 = sshll.u32 %s183_s20, 4  ;;  %s185_s23 = smov 8   ;;  %s29_s21 = int_to_ptr.vmem [resolvable:$true] %s28_s21 }
   0x7   :  { %34 = dma.hbm_to_vmem [thread:$0]  %s27_s19, 512, %s29_s21, [#allocation6], %s184_s22, %s184_s22, %s185_s23  }
   0x8   :  { %176 = dma.done.wait [#allocation3], 128  }
   0x9   :  { %177 = vsyncadd [#allocation3], 4294967168 }
   0xa   :  { %178 = dma.done.wait [#allocation6], 512  }
   0xb   :  { %179 = vsyncadd [#allocation6], 4294966784  ;;  %v49_v0 = vld [vmem:[#allocation5 + $0x18] sm:$0xff]  ;;  %v48_v1 = vld [vmem:[#allocation5 + $0x10] sm:$0xff]  ;;  %vm54_vm0 = vcmask 261120   ;;  %s186_s24 = smov [#allocation7]  }
   0xc   :  { %70 = vmatpush.msra.mxu0 %v49_v0  ;;  %v47_v2 = vld [vmem:[#allocation5 + $0x8] sm:$0xff]  ;;  %v46_v3 = vld [vmem:[#allocation5] sm:$0xff]  ;;  %v45_v4 = vld [vmem:[#allocation2] sm:$0xff]  ;;  %s84_s25 = sshll.u32 %s186_s24, 4  ;;  %s86_s28 = sshll.u32 %s222_s3, 4  ;;  %s85_s25 = int_to_ptr.vmem [resolvable:$true] %s84_s25  ;;  %s87_s28 = int_to_ptr.hbm [resolvable:$true] %s86_s28 }
   0xd   :  { %v103_v5 = vld [vmem:[%s221_s2] ss:$0 sm:$0xff] }
   0xe   :  { %71 = vmatpush.msra.mxu0 %v48_v1 }
  0x10   :  { %72 = vmatpush.msra.mxu0 %v47_v2 }
  0x12   :  { %73 = vmatpush.msra.mxu0 %v46_v3 }
  0x13   :  { %97 = vmatmul.msk.f32.vlgmr.msra.gmra.mxu0 %vm54_vm0, %v45_v4 }
  0x90   :  { %v75_v6 = vpop.f32.mrf.mxu0 }
  0x91   :  { %v76_v7 = vadd.f32 %v103_v5, %v75_v6 }
  0x93   :  { %78 = vst.msk [vmem:[#allocation7] sm:$0xff] %vm54_vm0, %v76_v7 }
  0x94   :  { %89 = dma.vmem_to_hbm [thread:$0]  %s85_s25, 128, %s87_s28, [#allocation4]  }
  0x95   :  { %180 = dma.done.wait [#allocation4], 128  }
  0x96   :  { %181 = vsyncadd [#allocation4], 4294967168 }
  0x97   :  { %94 = vsyncpa [#allocation3], 1 }
  0x98   :  { %95 = vsyncpa [#allocation6], 1 }
  0x99   :  { %96 = vsyncpa [#allocation4], 1 }

</bundles_post_ra>
